<compile_context>
chip_gen: v5e
topology: v5e:2x2
jax: 0.10.0
libtpu: 0.0.40
codegen_flags: <defaults>
</compile_context>

<pallas_src>
import math

import jax
import jax.numpy as jnp
from jax.experimental import pallas as pl
from jax.experimental.pallas import tpu as pltpu


# --------------------------------------------------------------------------
# Pass 1: (tm, K) x (K, tn) matmul + bias, online log-sum-exp over vocab tiles.
# --------------------------------------------------------------------------
def _logits_lse_kernel(x_ref, w_ref, b_ref, logits_ref, lse_ref, m_ref, l_ref):
    # x_ref: (tm, Kp) bf16    w_ref: (Kp, tn) bf16    b_ref: (1, tn) f32
    # logits_ref: (tm, tn) logits_dtype    lse_ref: (tm, 1) f32
    # m_ref / l_ref: (tm, 1) f32 scratch, carried across the j (vocab) sweep.
    j = pl.program_id(1)
    nv = pl.num_programs(1)

    @pl.when(j == 0)
    def _():  # new row-tile: reset the online-LSE state
        m_ref[...] = jnp.full_like(m_ref, -jnp.inf)
        l_ref[...] = jnp.zeros_like(l_ref)

    # Full-depth logits for this (row-tile, vocab-tile): bf16 operands on the
    # MXU, f32 accumulation, written directly to the output block.
    logits = jnp.dot(x_ref[...], w_ref[...],
                     preferred_element_type=jnp.float32) + b_ref[...]
    logits_ref[...] = logits.astype(logits_ref.dtype)

    # Online softmax statistics (f32).
    m_prev = m_ref[...]
    m_new = jnp.maximum(m_prev, jnp.max(logits, axis=-1, keepdims=True))
    l_ref[...] = (l_ref[...] * jnp.exp(m_prev - m_new)
                  + jnp.sum(jnp.exp(logits - m_new), axis=-1, keepdims=True))
    m_ref[...] = m_new

    @pl.when(j == nv - 1)
    def _():  # last vocab tile of this row-tile: emit log-sum-exp
        lse_ref[...] = m_ref[...] + jnp.log(l_ref[...])


# --------------------------------------------------------------------------
# Pass 2: log_probs = logits - lse (lane-dense, HBM-bound).
# --------------------------------------------------------------------------
def _normalize_kernel(logits_ref, lse_ref, o_ref):
    o_ref[...] = (logits_ref[...].astype(jnp.float32)
                  - lse_ref[...]).astype(o_ref.dtype)


# --------------------------------------------------------------------------
# Tiling helpers.
# --------------------------------------------------------------------------
def _round_up(a, b):
    return -(-a // b) * b


def _pick_tile(size, desired, unit):
    """Tile that is a multiple of `unit`, <= desired, and (preferably) divides
    the unit-rounded size, so padding stays at the (8,128) layout minimum."""
    base = _round_up(max(size, 1), unit)
    desired = max(unit, (min(desired, base) // unit) * unit)
    t = desired
    while t > unit and base % t != 0:
        t -= unit
    if t * 4 < desired and base > 4 * desired:
        # Degenerate divisor structure (prime-ish size): accept extra padding
        # rather than tiny tiles.
        return desired, _round_up(size, desired)
    return t, base


def _largest_divisor_tile(size, desired, unit):
    """Largest multiple of `unit` that is <= desired and divides `size`
    (size is already a multiple of `unit`)."""
    t = max(unit, (min(desired, size) // unit) * unit)
    while t > unit and size % t != 0:
        t -= unit
    return t


# --------------------------------------------------------------------------
# One-time parameter preparation (keep OUT of the hot forward path).
# --------------------------------------------------------------------------
def prepare_projection_head(weight, bias, *, tn=512, mxu_dtype=jnp.bfloat16):
    """Transpose the PyTorch-layout (vocab, d_model) weight to (d_model, vocab),
    pad to the kernel tiling, cast to the MXU dtype, and pad the bias with a
    very negative value so padded vocab columns vanish from the LSE."""
    vocab, d_model = weight.shape
    tn_eff, Vp = _pick_tile(vocab, tn, 128)
    Kp = _round_up(d_model, 128)
    w_t = jnp.pad(weight.T.astype(mxu_dtype),
                  ((0, Kp - d_model), (0, Vp - vocab)))
    b_p = jnp.pad(bias.astype(jnp.float32), (0, Vp - vocab),
                  constant_values=jnp.float32(-1e30)).reshape(1, Vp)
    meta = dict(d_model=d_model, vocab=vocab, Kp=Kp, Vp=Vp, tn=tn_eff,
                mxu_dtype=mxu_dtype)
    return w_t, b_p, meta


# --------------------------------------------------------------------------
# Forward: log_softmax(x @ W^T + b, axis=-1).
# --------------------------------------------------------------------------
def projection_head_forward(x, w_t, b_p, meta, *, tm=512,
                            logits_dtype=jnp.bfloat16, out_dtype=None):
    """x: (..., d_model); w_t/b_p/meta from prepare_projection_head.

    tm default 512 fits the v7x 64-MiB VMEM budget; on v6e (128 MiB, highest
    compute/BW ratio) callers can pass tm=768..1024; on v5e (HBM-bound) keep
    tm at 256..512 — the bf16 logits intermediate matters more there.
    """
    d_model, vocab = meta["d_model"], meta["vocab"]
    Kp, Vp, tn = meta["Kp"], meta["Vp"], meta["tn"]
    mxu_dtype = meta["mxu_dtype"]
    assert x.shape[-1] == d_model
    out_dtype = x.dtype if out_dtype is None else out_dtype

    lead_shape = x.shape[:-1]
    x2d = x.reshape(-1, d_model)
    M = x2d.shape[0]

    tm_eff, Mp = _pick_tile(M, tm, 8)

    # Shrink tm until the double-buffered working set fits a conservative
    # VMEM budget (safe on v7x's 64-MiB part as well as v5e/v6e).
    mxu_bytes = jnp.dtype(mxu_dtype).itemsize
    log_bytes = jnp.dtype(logits_dtype).itemsize

    def p1_vmem(tm_):
        return (2 * (tm_ * Kp * mxu_bytes + Kp * tn * mxu_bytes
                     + tm_ * tn * log_bytes)
                + tn * 4 + 3 * tm_ * 4)

    budget = 28 * 1024 * 1024
    while tm_eff > 8 and p1_vmem(tm_eff) > budget:
        tm_eff, Mp = _pick_tile(M, max(8, tm_eff // 2), 8)

    nm, nv = Mp // tm_eff, Vp // tn

    # Per-call input prep (rows/K padding only; the weight was prepped once).
    x_p = jnp.pad(x2d, ((0, Mp - M), (0, Kp - d_model))).astype(mxu_dtype)

    bytes_accessed = (x_p.size * mxu_bytes            # x read once
                      + nm * w_t.size * mxu_bytes     # weight streamed per row tile
                      + nm * b_p.size * 4
                      + Mp * Vp * log_bytes           # logits written (bf16)
                      + Mp * 4)                       # lse

    logits, lse = pl.pallas_call(
        _logits_lse_kernel,
        out_shape=(
            jax.ShapeDtypeStruct((Mp, Vp), logits_dtype),   # raw logits
            jax.ShapeDtypeStruct((Mp, 1), jnp.float32),     # per-row LSE
        ),
        grid_spec=pltpu.PrefetchScalarGridSpec(
            num_scalar_prefetch=0,
            grid=(nm, nv),
            in_specs=[
                pl.BlockSpec((tm_eff, Kp), lambda i, j: (i, 0)),  # x: once per row tile
                pl.BlockSpec((Kp, tn), lambda i, j: (0, j)),      # W^T streamed over vocab
                pl.BlockSpec((1, tn), lambda i, j: (0, j)),       # bias
            ],
            out_specs=[
                pl.BlockSpec((tm_eff, tn), lambda i, j: (i, j)),
                pl.BlockSpec((tm_eff, 1), lambda i, j: (i, 0)),
            ],
            scratch_shapes=[
                pltpu.VMEM((tm_eff, 1), jnp.float32),   # running max
                pltpu.VMEM((tm_eff, 1), jnp.float32),   # running sum-exp
            ],
        ),
        compiler_params=pltpu.CompilerParams(
            # Invariant: j must stay the inner "arbitrary" axis (online LSE).
            dimension_semantics=("parallel", "arbitrary"),
            vmem_limit_bytes=32 * 1024 * 1024,
        ),
        cost_estimate=pl.CostEstimate(
            flops=2 * Mp * Kp * Vp,
            transcendentals=Mp * Vp,
            bytes_accessed=bytes_accessed,
        ),
    )(x_p, w_t, b_p)

    # Pass 2: its own, larger lane-dense blocks (HBM-bound; big tiles amortize
    # the ~0.35 us per-step overhead).
    tm2 = _largest_divisor_tile(Mp, 512, 8)
    tn2 = _largest_divisor_tile(Vp, 2048, 128)
    nm2, nv2 = Mp // tm2, Vp // tn2

    out_p = pl.pallas_call(
        _normalize_kernel,
        out_shape=jax.ShapeDtypeStruct((Mp, Vp), out_dtype),
        grid_spec=pltpu.PrefetchScalarGridSpec(
            num_scalar_prefetch=0,
            grid=(nm2, nv2),
            in_specs=[
                pl.BlockSpec((tm2, tn2), lambda i, j: (i, j)),
                pl.BlockSpec((tm2, 1), lambda i, j: (i, 0)),
            ],
            out_specs=pl.BlockSpec((tm2, tn2), lambda i, j: (i, j)),
        ),
        compiler_params=pltpu.CompilerParams(
            dimension_semantics=("parallel", "parallel"),
        ),
    )(logits, lse)

    out = out_p
    if Mp != M or Vp != vocab:
        # Identity (elided) in the common unpadded case; only edge shapes pay.
        out = out[:M, :vocab]
    return out.reshape(*lead_shape, vocab)


def projection_head_apply(x, weight, bias, *, tn=512, mxu_dtype=jnp.bfloat16,
                          **kwargs):
    """Convenience one-shot wrapper (prep + forward). Prefer preparing once."""
    w_t, b_p, meta = prepare_projection_head(weight, bias, tn=tn,
                                             mxu_dtype=mxu_dtype)
    return projection_head_forward(x, w_t, b_p, meta, **kwargs)


def init_projection_head_params(key, d_model, vocab_size, dtype=jnp.float32):
    """Deterministic init mirroring nn.Linear's default (uniform +-1/sqrt(fan_in))."""
    kw, kb = jax.random.split(key)
    bound = 1.0 / math.sqrt(d_model)
    weight = jax.random.uniform(
        kw, (vocab_size, d_model), dtype=dtype, minval=-bound, maxval=bound)
    bias = jax.random.uniform(
        kb, (vocab_size,), dtype=dtype, minval=-bound, maxval=bound)
    return weight, bias


if __name__ == "__main__":
    # Small shapes consistent with the module: (batch, seq, d_model) -> (batch, seq, vocab)
    batch, seq, d_model, vocab_size = 2, 8, 256, 384

    key = jax.random.PRNGKey(0)
    kx, kp = jax.random.split(key)
    x = jax.random.normal(kx, (batch, seq, d_model), dtype=jnp.float32)
    weight, bias = init_projection_head_params(kp, d_model, vocab_size)

    # Reference with the same bf16 input/weight quantization the kernel uses
    # (accumulation and softmax stay in f32 in both).
    x_q = x.astype(jnp.bfloat16).astype(jnp.float32)
    w_q = weight.astype(jnp.bfloat16).astype(jnp.float32)
    ref = jax.nn.log_softmax(x_q @ w_q.T + bias.astype(jnp.float32), axis=-1)

    # One-time weight prep (transpose / pad / bf16 cast) outside the hot path.
    w_t, b_p, meta = prepare_projection_head(weight, bias)

    # 1) Default perf config (bf16 logits intermediate, big tiles -> single block here).
    out = projection_head_forward(x, w_t, b_p, meta)
    jax.block_until_ready(out)
    assert out.shape == (batch, seq, vocab_size)
    assert bool(jnp.all(jnp.isfinite(out))), "non-finite log-probs"
    assert jnp.allclose(out, ref, atol=3e-2, rtol=0), "mismatch (bf16 intermediate)"

    # 2) f32 logits intermediate: tight agreement with the reference.
    out_f32 = projection_head_forward(x, w_t, b_p, meta, logits_dtype=jnp.float32)
    jax.block_until_ready(out_f32)
    assert jnp.allclose(out_f32, ref, atol=2e-3, rtol=2e-3), "mismatch (f32 intermediate)"

    # 3) Small explicit tiles via the one-shot wrapper — exercises multi-tile
    #    vocab (online LSE across 3 tiles) and multiple row tiles.
    out_tiled = projection_head_apply(x, weight, bias, tm=8, tn=128,
                                      logits_dtype=jnp.float32)
    jax.block_until_ready(out_tiled)
    assert bool(jnp.all(jnp.isfinite(out_tiled))), "non-finite log-probs (tiled)"
    assert jnp.allclose(out_tiled, ref, atol=2e-3, rtol=2e-3), "mismatch (tiled)"

    print("KERNEL_OK")
</pallas_src>

<mosaic_0001>
module attributes {stable_mosaic.version = 11 : i64} {
  func.func @_logits_lse_kernel(%arg0: i32, %arg1: i32, %arg2: memref<16x256xbf16, #tpu.memory_space<vmem>>, %arg3: memref<256x384xbf16, #tpu.memory_space<vmem>>, %arg4: memref<1x384xf32, #tpu.memory_space<vmem>>, %arg5: memref<16x384xbf16, #tpu.memory_space<vmem>>, %arg6: memref<16x1xf32, #tpu.memory_space<vmem>>, %arg7: memref<16x1xf32, #tpu.memory_space<vmem>>, %arg8: memref<16x1xf32, #tpu.memory_space<vmem>>) attributes {dimension_semantics = [#tpu.dimension_semantics<parallel>, #tpu.dimension_semantics<arbitrary>], iteration_bounds = array<i64: 1, 1>, scalar_prefetch = 0 : i64, scratch_operands = 2 : i64, tpu.core_type = #tpu.core_type<tc>, window_params = [{transform_indices = @transform_0, window_bounds = array<i64: 16, 256>}, {transform_indices = @transform_1, window_bounds = array<i64: 256, 384>}, {transform_indices = @transform_2, window_bounds = array<i64: 1, 384>}, {transform_indices = @transform_3, window_bounds = array<i64: 16, 384>}, {transform_indices = @transform_4, window_bounds = array<i64: 16, 1>}]} {
    %c0_i32 = arith.constant 0 : i32
    %0 = arith.cmpi eq, %arg1, %c0_i32 : i32
    %1 = arith.extui %0 : i1 to i32
    %c0_i32_0 = arith.constant 0 : i32
    %2 = arith.cmpi ne, %1, %c0_i32_0 : i32
    scf.if %2 {
      %cst_20 = arith.constant 0xFF800000 : f32
      %30 = vector.broadcast %cst_20 : f32 to vector<16x1xf32>
      %c0_21 = arith.constant 0 : index
      %c0_22 = arith.constant 0 : index
      %31 = vector.load %arg7[%c0_21, %c0_22] : memref<16x1xf32, #tpu.memory_space<vmem>>, vector<16x1xf32>
      tpu.vector_store %arg7[%c0_21, %c0_22], %30 {strides = array<i32>} : memref<16x1xf32, #tpu.memory_space<vmem>>, vector<16x1xf32>,
      %cst_23 = arith.constant 0.000000e+00 : f32
      %32 = vector.broadcast %cst_23 : f32 to vector<16x1xf32>
      %c0_24 = arith.constant 0 : index
      %c0_25 = arith.constant 0 : index
      %33 = vector.load %arg8[%c0_24, %c0_25] : memref<16x1xf32, #tpu.memory_space<vmem>>, vector<16x1xf32>
      tpu.vector_store %arg8[%c0_24, %c0_25], %32 {strides = array<i32>} : memref<16x1xf32, #tpu.memory_space<vmem>>, vector<16x1xf32>,
    } else {
    }
    %c0 = arith.constant 0 : index
    %c0_1 = arith.constant 0 : index
    %3 = vector.load %arg2[%c0, %c0_1] : memref<16x256xbf16, #tpu.memory_space<vmem>>, vector<16x256xbf16>
    %c0_2 = arith.constant 0 : index
    %c0_3 = arith.constant 0 : index
    %4 = vector.load %arg3[%c0_2, %c0_3] : memref<256x384xbf16, #tpu.memory_space<vmem>>, vector<256x384xbf16>
    %cst = arith.constant dense<0.000000e+00> : vector<16x384xf32>
    %5 = tpu.matmul %3, %4, %cst {dimension_numbers = #tpu.dot_dimension_numbers<[1], [0], [0], [1], [0, 0, 1, 1], [], []>} : vector<16x256xbf16>, vector<256x384xbf16>, vector<16x384xf32> -> vector<16x384xf32>
    %c0_4 = arith.constant 0 : index
    %c0_5 = arith.constant 0 : index
    %6 = vector.load %arg4[%c0_4, %c0_5] : memref<1x384xf32, #tpu.memory_space<vmem>>, vector<1x384xf32>
    %7 = vector.broadcast %6 : vector<1x384xf32> to vector<16x384xf32>
    %8 = arith.addf %5, %7 : vector<16x384xf32>
    %9 = arith.truncf %8 : vector<16x384xf32> to vector<16x384xbf16>
    %c0_6 = arith.constant 0 : index
    %c0_7 = arith.constant 0 : index
    %10 = vector.load %arg5[%c0_6, %c0_7] : memref<16x384xbf16, #tpu.memory_space<vmem>>, vector<16x384xbf16>
    tpu.vector_store %arg5[%c0_6, %c0_7], %9 {strides = array<i32>} : memref<16x384xbf16, #tpu.memory_space<vmem>>, vector<16x384xbf16>,
    %c0_8 = arith.constant 0 : index
    %c0_9 = arith.constant 0 : index
    %11 = vector.load %arg7[%c0_8, %c0_9] : memref<16x1xf32, #tpu.memory_space<vmem>>, vector<16x1xf32>
    %cst_10 = arith.constant dense<0xFF800000> : vector<16xf32>
    %12 = vector.multi_reduction <maximumf>, %8, %cst_10 [1] : vector<16x384xf32> to vector<16xf32>
    %13 = vector.shape_cast %12 : vector<16xf32> to vector<16x1xf32>
    %14 = arith.maximumf %11, %13 : vector<16x1xf32>
    %c0_11 = arith.constant 0 : index
    %c0_12 = arith.constant 0 : index
    %15 = vector.load %arg8[%c0_11, %c0_12] : memref<16x1xf32, #tpu.memory_space<vmem>>, vector<16x1xf32>
    %16 = arith.subf %11, %14 : vector<16x1xf32>
    %17 = math.exp %16 : vector<16x1xf32>
    %18 = arith.mulf %15, %17 : vector<16x1xf32>
    %19 = vector.broadcast %14 : vector<16x1xf32> to vector<16x384xf32>
    %20 = arith.subf %8, %19 : vector<16x384xf32>
    %21 = math.exp %20 : vector<16x384xf32>
    %cst_13 = arith.constant dense<0.000000e+00> : vector<16xf32>
    %22 = vector.multi_reduction <add>, %21, %cst_13 [1] : vector<16x384xf32> to vector<16xf32>
    %23 = vector.shape_cast %22 : vector<16xf32> to vector<16x1xf32>
    %24 = arith.addf %18, %23 : vector<16x1xf32>
    %c0_14 = arith.constant 0 : index
    %c0_15 = arith.constant 0 : index
    %25 = vector.load %arg8[%c0_14, %c0_15] : memref<16x1xf32, #tpu.memory_space<vmem>>, vector<16x1xf32>
    tpu.vector_store %arg8[%c0_14, %c0_15], %24 {strides = array<i32>} : memref<16x1xf32, #tpu.memory_space<vmem>>, vector<16x1xf32>,
    %c0_16 = arith.constant 0 : index
    %c0_17 = arith.constant 0 : index
    %26 = vector.load %arg7[%c0_16, %c0_17] : memref<16x1xf32, #tpu.memory_space<vmem>>, vector<16x1xf32>
    tpu.vector_store %arg7[%c0_16, %c0_17], %14 {strides = array<i32>} : memref<16x1xf32, #tpu.memory_space<vmem>>, vector<16x1xf32>,
    %c0_i32_18 = arith.constant 0 : i32
    %27 = arith.cmpi eq, %arg1, %c0_i32_18 : i32
    %28 = arith.extui %27 : i1 to i32
    %c0_i32_19 = arith.constant 0 : i32
    %29 = arith.cmpi ne, %28, %c0_i32_19 : i32
    scf.if %29 {
      %c0_20 = arith.constant 0 : index
      %c0_21 = arith.constant 0 : index
      %30 = vector.load %arg7[%c0_20, %c0_21] : memref<16x1xf32, #tpu.memory_space<vmem>>, vector<16x1xf32>
      %c0_22 = arith.constant 0 : index
      %c0_23 = arith.constant 0 : index
      %31 = vector.load %arg8[%c0_22, %c0_23] : memref<16x1xf32, #tpu.memory_space<vmem>>, vector<16x1xf32>
      %32 = math.log %31 : vector<16x1xf32>
      %33 = arith.addf %30, %32 : vector<16x1xf32>
      %c0_24 = arith.constant 0 : index
      %c0_25 = arith.constant 0 : index
      %34 = vector.load %arg6[%c0_24, %c0_25] : memref<16x1xf32, #tpu.memory_space<vmem>>, vector<16x1xf32>
      tpu.vector_store %arg6[%c0_24, %c0_25], %33 {strides = array<i32>} : memref<16x1xf32, #tpu.memory_space<vmem>>, vector<16x1xf32>,
    } else {
    }
    return
  }
  func.func @transform_0(%arg0: i32, %arg1: i32) -> (i32, i32) {
    %c0_i32 = arith.constant 0 : i32
    %c0_i32_0 = arith.constant 0 : i32
    return %arg0, %c0_i32 : i32, i32
  }
  func.func @transform_1(%arg0: i32, %arg1: i32) -> (i32, i32) {
    %c0_i32 = arith.constant 0 : i32
    %c0_i32_0 = arith.constant 0 : i32
    return %c0_i32, %arg1 : i32, i32
  }
  func.func @transform_2(%arg0: i32, %arg1: i32) -> (i32, i32) {
    %c0_i32 = arith.constant 0 : i32
    %c0_i32_0 = arith.constant 0 : i32
    return %c0_i32, %arg1 : i32, i32
  }
  func.func @transform_3(%arg0: i32, %arg1: i32) -> (i32, i32) {
    %c0_i32 = arith.constant 0 : i32
    return %arg0, %arg1 : i32, i32
  }
  func.func @transform_4(%arg0: i32, %arg1: i32) -> (i32, i32) {
    %c0_i32 = arith.constant 0 : i32
    %c0_i32_0 = arith.constant 0 : i32
    return %arg0, %c0_i32 : i32, i32
  }
}

</mosaic_0001>

<bundles_post_ra>
// kernel: tpu_custom_call.1
= control target key start
LH: loop header
LB: loop body
LE: loop exit
PB: predicated region body
PF: predicated region fallthrough
CT: control target
= control target key end

     0   :  { %10 = vsyncpa [#allocation5], 0  ;;  %s1067_s0 = inlined_call_operand.hbm [shape: bf16[16,256], index: 0, kind: input, shape index: {}]   ;;  %s1068_s1 = inlined_call_operand.hbm [shape: bf16[256,384], index: 1, kind: input, shape index: {}]   ;;  %s1069_s2 = inlined_call_operand.hbm [shape: f32[1,384], index: 2, kind: input, shape index: {}]   ;;  %s1070_s3 = inlined_call_operand.hbm [shape: bf16[16,384], index: 3, kind: output, shape index: {0}]   ;;  %s1071_s4 = inlined_call_operand.vmem [shape: f32[16,1], index: 4, kind: output, shape index: {1}]  }
   0x1   :  { %11 = vsyncpa [#allocation8], 0  ;;  %s30_s17 = sshll.u32 %s1068_s1, 4  ;;  %s31_s17 = int_to_ptr.hbm [resolvable:$true] %s30_s17 }
   0x2   :  { %12 = vsyncpa [#allocation6], 0  ;;  %s992_s18 = smov [#allocation7]   ;;  %s17_s22 = sshll.u32 %s1067_s0, 4  ;;  %s18_s22 = int_to_ptr.hbm [resolvable:$true] %s17_s22 }
   0x3   :  { %s32_s19 = sshll.u32 %s992_s18, 4  ;;  %s993_s23 = smov 192   ;;  %s33_s19 = int_to_ptr.vmem [resolvable:$true] %s32_s19 }
   0x4   :  { %s994_s24 = smov 12   ;;  %s995_s25 = smov [#allocation4]  }
   0x5   :  { %38 = dma.hbm_to_vmem [thread:$0]  %s31_s17, 6144, %s33_s19, [#allocation8], %s993_s23, %s993_s23, %s994_s24  }
   0x6   :  { %s19_s26 = sshll.u32 %s995_s25, 4  ;;  %s996_s1 = smov 128   ;;  %s20_s26 = int_to_ptr.vmem [resolvable:$true] %s19_s26 }
   0x7   :  { %s997_s27 = smov 8   ;;  %s44_s30 = sshll.u32 %s1069_s2, 4  ;;  %s45_s30 = int_to_ptr.hbm [resolvable:$true] %s44_s30 }
   0x8   :  { %25 = dma.hbm_to_vmem [thread:$0]  %s18_s22, 256, %s20_s26, [#allocation5], %s996_s1, %s996_s1, %s997_s27  }
   0x9   :  { %s998_s5 = smov [#allocation9]  }
   0xa   :  { %s46_s0 = sshll.u32 %s998_s5, 4  ;;  %s47_s0 = int_to_ptr.vmem [resolvable:$true] %s46_s0 }
   0xb   :  { %49 = dma.hbm_to_vmem [thread:$0]  %s45_s30, 48, %s47_s0, [#allocation8]  }
   0xc   :  { %986 = dma.done.wait [#allocation5], 256  }
   0xd   :  { %987 = vsyncadd [#allocation5], 4294967040 }
   0xe   :  { %988 = dma.done.wait [#allocation8], 6192  }
   0xf   :  { %989 = vsyncadd [#allocation8], 4294961104  ;;  %v701_v0 = vld [vmem:[#allocation7 + $0xa8] sm:$0xf]  ;;  %v831_v1 = vld [vmem:[#allocation7 + $0xb0] sm:$0xf0] }
  0x10   :  { %v797_v2 = vld [vmem:[#allocation7 + $0x168] sm:$0xf]  ;;  %v702_v3 = vor.u32 %v831_v1, %v701_v0  ;;  %v855_v4 = vld [vmem:[#allocation7 + $0x170] sm:$0xf0]  ;;  %v830_v5 = vld [vmem:[#allocation7 + $0xac] sm:$0xf] }
  0x11   :  { %v703_v6 = vld [vmem:[#allocation7 + $0xb4] sm:$0xf0]  ;;  %v798_v7 = vor.u32 %v855_v4, %v797_v2  ;;  %v854_v9 = vld [vmem:[#allocation7 + $0x16c] sm:$0xf]  ;;  %v689_v11 = vld [vmem:[#allocation7 + $0x90] sm:$0xf] }
  0x12   :  { %v706_v8 = vor.u32 %v830_v5, %v703_v6  ;;  %v799_v10 = vld [vmem:[#allocation7 + $0x174] sm:$0xf0]  ;;  %411 = vmatpush.bf16.msra.mxu0 %v702_v3  ;;  %v828_v13 = vld [vmem:[#allocation7 + $0x98] sm:$0xf0]  ;;  %v785_v14 = vld [vmem:[#allocation7 + $0x150] sm:$0xf] }
  0x13   :  { %v802_v12 = vor.u32 %v854_v9, %v799_v10  ;;  %v852_v15 = vld [vmem:[#allocation7 + $0x158] sm:$0xf0]  ;;  %425 = vmatpush.bf16.msra.mxu1 %v798_v7  ;;  %v690_v16 = vor.u32 %v828_v13, %v689_v11  ;;  %v827_v18 = vld [vmem:[#allocation7 + $0x94] sm:$0xf]  ;;  %v691_v19 = vld [vmem:[#allocation7 + $0x9c] sm:$0xf0] }
  0x14   :  { %439 = vmatpush.bf16.msra.mxu2 %v706_v8  ;;  %v786_v17 = vor.u32 %v852_v15, %v785_v14  ;;  %v851_v20 = vld [vmem:[#allocation7 + $0x154] sm:$0xf]  ;;  %v694_v21 = vor.u32 %v827_v18, %v691_v19  ;;  %v787_v22 = vld [vmem:[#allocation7 + $0x15c] sm:$0xf0]  ;;  %v677_v23 = vld [vmem:[#allocation7 + $0x78] sm:$0xf] }
  0x15   :  { %453 = vmatpush.bf16.msra.mxu3 %v802_v12  ;;  %v825_v24 = vld [vmem:[#allocation7 + $0x80] sm:$0xf0]  ;;  %v790_v25 = vor.u32 %v851_v20, %v787_v22  ;;  %v773_v26 = vld [vmem:[#allocation7 + $0x138] sm:$0xf]  ;;  %v824_v28 = vld [vmem:[#allocation7 + $0x7c] sm:$0xf] }
  0x16   :  { %v849_v27 = vld [vmem:[#allocation7 + $0x140] sm:$0xf0]  ;;  %412 = vmatpush.bf16.msra.mxu0 %v690_v16  ;;  %v678_v29 = vor.u32 %v825_v24, %v677_v23  ;;  %v679_v30 = vld [vmem:[#allocation7 + $0x84] sm:$0xf0]  ;;  %v848_v31 = vld [vmem:[#allocation7 + $0x13c] sm:$0xf] }
  0x17   :  { %v775_v32 = vld [vmem:[#allocation7 + $0x144] sm:$0xf0]  ;;  %426 = vmatpush.bf16.msra.mxu1 %v786_v17  ;;  %v774_v33 = vor.u32 %v849_v27, %v773_v26  ;;  %v682_v34 = vor.u32 %v824_v28, %v679_v30  ;;  %v665_v35 = vld [vmem:[#allocation7 + $0x60] sm:$0xf]  ;;  %v822_v36 = vld [vmem:[#allocation7 + $0x68] sm:$0xf0] }
  0x18   :  { %440 = vmatpush.bf16.msra.mxu2 %v694_v21  ;;  %v761_v37 = vld [vmem:[#allocation7 + $0x120] sm:$0xf]  ;;  %v778_v38 = vor.u32 %v848_v31, %v775_v32  ;;  %v846_v39 = vld [vmem:[#allocation7 + $0x128] sm:$0xf0]  ;;  %v821_v40 = vld [vmem:[#allocation7 + $0x64] sm:$0xf]  ;;  %v666_v44 = vor.u32 %v822_v36, %v665_v35 }
  0x19   :  { %454 = vmatpush.bf16.msra.mxu3 %v790_v25  ;;  %v667_v41 = vld [vmem:[#allocation7 + $0x6c] sm:$0xf0]  ;;  %v845_v42 = vld [vmem:[#allocation7 + $0x124] sm:$0xf]  ;;  %v762_v45 = vor.u32 %v846_v39, %v761_v37  ;;  %v653_v47 = vld [vmem:[#allocation7 + $0x48] sm:$0xf] }
  0x1a   :  { %v763_v43 = vld [vmem:[#allocation7 + $0x12c] sm:$0xf0]  ;;  %413 = vmatpush.bf16.msra.mxu0 %v678_v29  ;;  %v670_v46 = vor.u32 %v821_v40, %v667_v41  ;;  %v819_v48 = vld [vmem:[#allocation7 + $0x50] sm:$0xf0]  ;;  %v749_v49 = vld [vmem:[#allocation7 + $0x108] sm:$0xf] }
  0x1b   :  { %427 = vmatpush.bf16.msra.mxu1 %v774_v33  ;;  %v766_v50 = vor.u32 %v845_v42, %v763_v43  ;;  %v843_v51 = vld [vmem:[#allocation7 + $0x110] sm:$0xf0]  ;;  %v818_v52 = vld [vmem:[#allocation7 + $0x4c] sm:$0xf]  ;;  %v655_v53 = vld [vmem:[#allocation7 + $0x54] sm:$0xf0]  ;;  %v654_v56 = vor.u32 %v819_v48, %v653_v47 }
  0x1c   :  { %441 = vmatpush.bf16.msra.mxu2 %v682_v34  ;;  %v842_v54 = vld [vmem:[#allocation7 + $0x10c] sm:$0xf]  ;;  %v751_v55 = vld [vmem:[#allocation7 + $0x114] sm:$0xf0]  ;;  %v750_v57 = vor.u32 %v843_v51, %v749_v49  ;;  %v658_v58 = vor.u32 %v818_v52, %v655_v53  ;;  %v641_v59 = vld [vmem:[#allocation7 + $0x30] sm:$0xf] }
  0x1d   :  { %455 = vmatpush.bf16.msra.mxu3 %v778_v38  ;;  %v816_v60 = vld [vmem:[#allocation7 + $0x38] sm:$0xf0]  ;;  %v737_v61 = vld [vmem:[#allocation7 + $0xf0] sm:$0xf]  ;;  %v754_v62 = vor.u32 %v842_v54, %v751_v55  ;;  %v815_v0 = vld [vmem:[#allocation7 + $0x34] sm:$0xf] }
  0x1e   :  { %414 = vmatpush.bf16.msra.mxu0 %v666_v44  ;;  %v840_v63 = vld [vmem:[#allocation7 + $0xf8] sm:$0xf0]  ;;  %v643_v1 = vld [vmem:[#allocation7 + $0x3c] sm:$0xf0]  ;;  %v839_v2 = vld [vmem:[#allocation7 + $0xf4] sm:$0xf]  ;;  %v642_v4 = vor.u32 %v816_v60, %v641_v59 }
  0x1f   :  { %428 = vmatpush.bf16.msra.mxu1 %v762_v45  ;;  %v739_v3 = vld [vmem:[#allocation7 + $0xfc] sm:$0xf0]  ;;  %v738_v5 = vor.u32 %v840_v63, %v737_v61  ;;  %v646_v6 = vor.u32 %v815_v0, %v643_v1  ;;  %v629_v7 = vld [vmem:[#allocation7 + $0x18] sm:$0xf]  ;;  %v813_v8 = vld [vmem:[#allocation7 + $0x20] sm:$0xf0] }
  0x20   :  { %442 = vmatpush.bf16.msra.mxu2 %v670_v46  ;;  %v725_v9 = vld [vmem:[#allocation7 + $0xd8] sm:$0xf]  ;;  %v742_v10 = vor.u32 %v839_v2, %v739_v3  ;;  %v837_v11 = vld [vmem:[#allocation7 + $0xe0] sm:$0xf0]  ;;  %v812_v12 = vld [vmem:[#allocation7 + $0x1c] sm:$0xf]  ;;  %v630_v16 = vor.u32 %v813_v8, %v629_v7 }
  0x21   :  { %456 = vmatpush.bf16.msra.mxu3 %v766_v50  ;;  %v631_v13 = vld [vmem:[#allocation7 + $0x24] sm:$0xf0]  ;;  %v836_v14 = vld [vmem:[#allocation7 + $0xdc] sm:$0xf]  ;;  %v617_v17 = vld [vmem:[#allocation7] sm:$0xf]  ;;  %v726_v18 = vor.u32 %v837_v11, %v725_v9 }
  0x22   :  { %415 = vmatpush.bf16.msra.mxu0 %v654_v56  ;;  %v727_v15 = vld [vmem:[#allocation7 + $0xe4] sm:$0xf0]  ;;  %v634_v19 = vor.u32 %v812_v12, %v631_v13  ;;  %v810_v20 = vld [vmem:[#allocation7 + $0x8] sm:$0xf0]  ;;  %v713_v21 = vld [vmem:[#allocation7 + $0xc0] sm:$0xf] }
  0x23   :  { %429 = vmatpush.bf16.msra.mxu1 %v750_v57  ;;  %v834_v22 = vld [vmem:[#allocation7 + $0xc8] sm:$0xf0]  ;;  %v730_v23 = vor.u32 %v836_v14, %v727_v15  ;;  %v809_v24 = vld [vmem:[#allocation7 + $0x4] sm:$0xf]  ;;  %v619_v25 = vld [vmem:[#allocation7 + $0xc] sm:$0xf0]  ;;  %v618_v30 = vor.u32 %v810_v20, %v617_v17 }
  0x24   :  { %443 = vmatpush.bf16.msra.mxu2 %v658_v58  ;;  %v709_v26 = vld [vmem:[#allocation7 + $0xb0] sm:$0xf]  ;;  %v832_v27 = vld [vmem:[#allocation7 + $0xb8] sm:$0xf0]  ;;  %v833_v31 = vld [vmem:[#allocation7 + $0xc4] sm:$0xf]  ;;  %v714_v33 = vor.u32 %v834_v22, %v713_v21  ;;  %v622_v34 = vor.u32 %v809_v24, %v619_v25 }
  0x25   :  { %457 = vmatpush.bf16.msra.mxu3 %v754_v62  ;;  %v805_v28 = vld [vmem:[#allocation7 + $0x170] sm:$0xf]  ;;  %v856_v29 = vld [vmem:[#allocation7 + $0x178] sm:$0xf0]  ;;  %v808_v36 = vld [vmem:[#allocation4 + $0x4] sm:$0xf0]  ;;  %v710_v37 = vor.u32 %v832_v27, %v709_v26 }
  0x26   :  { %416 = vmatpush.bf16.msra.mxu0 %v642_v4  ;;  %v715_v32 = vld [vmem:[#allocation7 + $0xcc] sm:$0xf0]  ;;  %v806_v38 = vor.u32 %v856_v29, %v805_v28  ;;  %v807_v39 = vld [vmem:[#allocation4 + $0x4] sm:$0xf]  ;;  %v611_v41 = vld [vmem:[#allocation4 + $0x8] sm:$0xf0] }
  0x27   :  { %430 = vmatpush.bf16.msra.mxu1 %v738_v5  ;;  %v609_v35 = vld [vmem:[#allocation4] sm:$0xf]  ;;  %v718_v40 = vor.u32 %v833_v31, %v715_v32  ;;  %v697_v42 = vld [vmem:[#allocation7 + $0x98] sm:$0xf]  ;;  %v829_v43 = vld [vmem:[#allocation7 + $0xa0] sm:$0xf0]  ;;  %v614_v47 = vor.u32 %v807_v39, %v611_v41 }
  0x28   :  { %444 = vmatpush.bf16.msra.mxu2 %v646_v6  ;;  %v1040_v44 = vor.u32 %v808_v36, %v609_v35  ;;  %v793_v45 = vld [vmem:[#allocation7 + $0x158] sm:$0xf]  ;;  %v853_v46 = vld [vmem:[#allocation7 + $0x160] sm:$0xf0]  ;;  %v698_v48 = vor.u32 %v829_v43, %v697_v42  ;;  %v685_v50 = vld [vmem:[#allocation7 + $0x80] sm:$0xf] }
  0x29   :  { %458 = vmatpush.bf16.msra.mxu3 %v742_v10  ;;  %v794_v49 = vor.u32 %v853_v46, %v793_v45  ;;  %v826_v51 = vld [vmem:[#allocation7 + $0x88] sm:$0xf0]  ;;  %v781_v52 = vld [vmem:[#allocation7 + $0x140] sm:$0xf]  ;;  %v673_v56 = vld [vmem:[#allocation7 + $0x68] sm:$0xf] }
  0x2a   :  { %417 = vmatpush.bf16.msra.mxu0 %v630_v16  ;;  %v850_v53 = vld [vmem:[#allocation7 + $0x148] sm:$0xf0]  ;;  %v686_v54 = vor.u32 %v826_v51, %v685_v50  ;;  %v823_v57 = vld [vmem:[#allocation7 + $0x70] sm:$0xf0]  ;;  %v769_v58 = vld [vmem:[#allocation7 + $0x128] sm:$0xf] }
  0x2b   :  { %431 = vmatpush.bf16.msra.mxu1 %v726_v18  ;;  %v782_v55 = vor.u32 %v850_v53, %v781_v52  ;;  %v847_v59 = vld [vmem:[#allocation7 + $0x130] sm:$0xf0]  ;;  %v674_v60 = vor.u32 %v823_v57, %v673_v56  ;;  %v661_v62 = vld [vmem:[#allocation7 + $0x50] sm:$0xf]  ;;  %v820_v63 = vld [vmem:[#allocation7 + $0x58] sm:$0xf0] }
  0x2c   :  { %445 = vmatpush.bf16.msra.mxu2 %v634_v19  ;;  %v770_v61 = vor.u32 %v847_v59, %v769_v58  ;;  %v757_v0 = vld [vmem:[#allocation7 + $0x110] sm:$0xf]  ;;  %v844_v1 = vld [vmem:[#allocation7 + $0x118] sm:$0xf0]  ;;  %v662_v2 = vor.u32 %v820_v63, %v661_v62  ;;  %v649_v4 = vld [vmem:[#allocation7 + $0x38] sm:$0xf] }
  0x2d   :  { %459 = vmatpush.bf16.msra.mxu3 %v730_v23  ;;  %v758_v3 = vor.u32 %v844_v1, %v757_v0  ;;  %v817_v5 = vld [vmem:[#allocation7 + $0x40] sm:$0xf0]  ;;  %v745_v6 = vld [vmem:[#allocation7 + $0xf8] sm:$0xf]  ;;  %v637_v10 = vld [vmem:[#allocation7 + $0x20] sm:$0xf] }
  0x2e   :  { %418 = vmatpush.bf16.msra.mxu0 %v618_v30  ;;  %v841_v7 = vld [vmem:[#allocation7 + $0x100] sm:$0xf0]  ;;  %v650_v8 = vor.u32 %v817_v5, %v649_v4  ;;  %v814_v11 = vld [vmem:[#allocation7 + $0x28] sm:$0xf0]  ;;  %v733_v12 = vld [vmem:[#allocation7 + $0xe0] sm:$0xf] }
  0x2f   :  { %432 = vmatpush.bf16.msra.mxu1 %v714_v33  ;;  %v746_v9 = vor.u32 %v841_v7, %v745_v6  ;;  %v838_v13 = vld [vmem:[#allocation7 + $0xe8] sm:$0xf0]  ;;  %v638_v14 = vor.u32 %v814_v11, %v637_v10  ;;  %v625_v16 = vld [vmem:[#allocation7 + $0x8] sm:$0xf]  ;;  %v811_v17 = vld [vmem:[#allocation7 + $0x10] sm:$0xf0] }
  0x30   :  { %446 = vmatpush.bf16.msra.mxu2 %v622_v34  ;;  %v734_v15 = vor.u32 %v838_v13, %v733_v12  ;;  %v721_v18 = vld [vmem:[#allocation7 + $0xc8] sm:$0xf]  ;;  %v835_v19 = vld [vmem:[#allocation7 + $0xd0] sm:$0xf0]  ;;  %v626_v20 = vor.u32 %v811_v17, %v625_v16  ;;  %v137_v22 = vld [vmem:[#allocation9] sm:$0x7] }
  0x31   :  { %460 = vmatpush.bf16.msra.mxu3 %v718_v40  ;;  %419 = vmatmul.bf16.vlgmr.msra.gmra.mxu0 %v1040_v44  ;;  %v722_v21 = vor.u32 %v835_v19, %v721_v18  ;;  %v139_v23 = vperm.slane %v137_v22, 0  ;;  %v140_v27 = vperm.slane %v137_v22, 1  ;;  %vm66_vm0 = vcmask 7168   ;;  %s1002_s2 = smov [#allocation10]   ;;  %s589_s9 = sshll.u32 %s1070_s3, 4  ;;  %s590_s9 = int_to_ptr.hbm [resolvable:$true] %s589_s9 }
  0x32   :  { %467 = vmatpush.bf16.msrb.mxu0 %v710_v37  ;;  %433 = vmatmul.bf16.vlgmr.msra.gmra.mxu1 %v614_v47  ;;  %v999_v40 = vmov -inf   ;;  %v1000_v59 = vmov 0   ;;  %s587_s6 = sshll.u32 %s1002_s2, 4  ;;  %s588_s6 = int_to_ptr.vmem [resolvable:$true] %s587_s6 }
  0x33   :  { %481 = vmatpush.bf16.msrb.mxu1 %v806_v38  ;;  %447 = vmatmul.bf16.vlgmr.msra.gmra.mxu2 %v1040_v44  ;;  %67 = vst.msk [vmem:[#allocation2] sm:$0xff] %vm66_vm0, %v999_v40 }
  0x34   :  { %461 = vmatmul.bf16.vlgmr.msra.gmra.mxu3 %v614_v47  ;;  %68 = vst.msk [vmem:[#allocation2 + $0x8] sm:$0xff] %vm66_vm0, %v999_v40  ;;  %868 = vset.pattern.permute.xlu1 %v1000_v59 }
  0x35   :  { %869 = vset.pattern.permute.xlu0 %v1000_v59 }
  0x36   :  { %468 = vmatpush.bf16.msrb.mxu0 %v698_v48 }
  0x37   :  { %482 = vmatpush.bf16.msrb.mxu1 %v794_v49 }
  0x3a   :  { %469 = vmatpush.bf16.msrb.mxu0 %v686_v54 }
  0x3b   :  { %483 = vmatpush.bf16.msrb.mxu1 %v782_v55  ;;  %v504_v1 = vld [vmem:[#allocation2 + $0x8] sm:$0xff] }
  0x3e   :  { %470 = vmatpush.bf16.msrb.mxu0 %v674_v60  ;;  %v1001_v60 = vmov 0.0  }
  0x3f   :  { %484 = vmatpush.bf16.msrb.mxu1 %v770_v61  ;;  %69 = vst.msk [vmem:[#allocation3] sm:$0xff] %vm66_vm0, %v1001_v60  ;;  %v503_v61 = vld [vmem:[#allocation2] sm:$0xff] }
  0x40   :  { %70 = vst.msk [vmem:[#allocation3 + $0x8] sm:$0xff] %vm66_vm0, %v1001_v60 }
  0x42   :  { %471 = vmatpush.bf16.msrb.mxu0 %v662_v2 }
  0x43   :  { %485 = vmatpush.bf16.msrb.mxu1 %v758_v3 }
  0x46   :  { %472 = vmatpush.bf16.msrb.mxu0 %v650_v8 }
  0x47   :  { %486 = vmatpush.bf16.msrb.mxu1 %v746_v9 }
  0x4a   :  { %473 = vmatpush.bf16.msrb.mxu0 %v638_v14 }
  0x4b   :  { %487 = vmatpush.bf16.msrb.mxu1 %v734_v15 }
  0x4e   :  { %474 = vmatpush.bf16.msrb.mxu0 %v626_v20 }
  0x4f   :  { %488 = vmatpush.bf16.msrb.mxu1 %v722_v21 }
  0x51   :  { %475 = vmatmul.bf16.vlgmr.msrb.gmra.mxu0 %v1040_v44  ;;  %v141_v44 = vperm.slane %v137_v22, 2 }
  0x52   :  { %489 = vmatmul.bf16.vlgmr.msrb.gmra.mxu1 %v614_v47 }
  0xae   :  { %v420_v24 = vpop.f32.mrf.mxu0 }
  0xaf   :  { %v434_v25 = vpop.f32.mrf.mxu1  ;;  %v421_v26 = vadd.f32 %v420_v24, %v139_v23 }
  0xb1   :  { %v435_v30 = vadd.f32 %v434_v25, %v421_v26 }
  0xb6   :  { %v448_v28 = vpop.f32.mrf.mxu2  ;;  %v422_v32 = vpop.f32.mrf.mxu0 }
  0xb7   :  { %v449_v29 = vadd.f32 %v448_v28, %v140_v27  ;;  %v462_v31 = vpop.f32.mrf.mxu3  ;;  %v423_v35 = vadd.f32 %v422_v32, %v139_v23  ;;  %v436_v36 = vpop.f32.mrf.mxu1  ;;  %v515_v32 = vld [vmem:[#allocation3] sm:$0xff] }
  0xb9   :  { %v463_v33 = vadd.f32 %v462_v31, %v449_v29  ;;  %v437_v39 = vadd.f32 %v436_v36, %v423_v35 }
  0xbb   :  { %v495_v34 = vpack.c.bf16 %v463_v33, %v435_v30 }
  0xbd   :  { %499 = vst [vmem:[#allocation10] sm:$0xff] %v495_v34 }
  0xbe   :  { %v450_v37 = vpop.f32.mrf.mxu2 }
  0xbf   :  { %v451_v38 = vadd.f32 %v450_v37, %v140_v27  ;;  %v464_v41 = vpop.f32.mrf.mxu3  ;;  %v516_v37 = vld [vmem:[#allocation3 + $0x8] sm:$0xff] }
  0xc1   :  { %v465_v42 = vadd.f32 %v464_v41, %v451_v38 }
  0xc3   :  { %v497_v43 = vpack.c.bf16 %v465_v42, %v437_v39 }
  0xc5   :  { %501 = vst [vmem:[#allocation10 + $0xc] sm:$0xff] %v497_v43 }
  0xce   :  { %v476_v45 = vpop.f32.mrf.mxu0 }
  0xcf   :  { %v477_v46 = vadd.f32 %v476_v45, %v141_v44  ;;  %v490_v47 = vpop.f32.mrf.mxu1 }
  0xd1   :  { %v491_v48 = vadd.f32 %v490_v47, %v477_v46 }
  0xd3   :  { %v496_v49 = vpack.c.bf16 %v491_v48, %v491_v48  ;;  %v505_v50 = vmax.f32 %v435_v30, %v491_v48 }
  0xd5   :  { %500 = vst [vmem:[#allocation10 + $0x8] sm:$0xf] %v496_v49  ;;  %v506_v51 = vmax.f32 %v505_v50, %v463_v33 }
  0xd6   :  { %v478_v52 = vpop.f32.mrf.mxu0 }
  0xd7   :  { %v479_v53 = vadd.f32 %v478_v52, %v141_v44  ;;  %507 = vmax.xlane.f32.xlu0 %v506_v51  ;;  %v492_v54 = vpop.f32.mrf.mxu1 }
  0xd9   :  { %v493_v55 = vadd.f32 %v492_v54, %v479_v53 }
  0xdb   :  { %v498_v56 = vpack.c.bf16 %v493_v55, %v493_v55  ;;  %v509_v57 = vmax.f32 %v437_v39, %v493_v55 }
  0xdd   :  { %502 = vst [vmem:[#allocation10 + $0x14] sm:$0xf] %v498_v56  ;;  %v510_v58 = vmax.f32 %v509_v57, %v465_v42 }
  0xde   :  { %595 = dma.vmem_to_hbm [thread:$0]  %s588_s6, 384, %s590_s9, [#allocation6], %s993_s23, %s993_s23, %s994_s24  }
  0xdf   :  { %511 = vmax.xlane.f32.xlu0 %v510_v58 }
 0x14a   :  { %v508_v62 = vpop.xlane.xlu0 %507 }
 0x14b   :  { %v513_v63 = vmax.f32 %v503_v61, %v508_v62 }
 0x14d   :  { %v517_v0 = vsub.f32 %v503_v61, %v513_v63  ;;  %566 = vst.msk [vmem:[#allocation2] sm:$0xff] %vm66_vm0, %v513_v63  ;;  %527 = vperm.xlu1 %868, %v513_v63  }
 0x14f   :  { %v519_v29 = vmul.f32 1.442695, %v517_v0 }
 0x152   :  { %v512_v2 = vpop.xlane.xlu0 %511 }
 0x153   :  { %v514_v3 = vmax.f32 %v504_v1, %v512_v2 }
 0x154   :  { %v571_v45 = vld [vmem:[#allocation2] sm:$0xff] }
 0x155   :  { %v518_v4 = vsub.f32 %v504_v1, %v514_v3  ;;  %567 = vst.msk [vmem:[#allocation2 + $0x8] sm:$0xff] %vm66_vm0, %v514_v3  ;;  %532 = vperm.xlu1 %868, %v514_v3  }
 0x15c   :  { %v572_v49 = vld [vmem:[#allocation2 + $0x8] sm:$0xff] }
 0x1bf   :  { %v528_v5 = vpop.permute.xlu1 %527 }
 0x1c0   :  { %v535_v6 = vsub.f32 %v435_v30, %v528_v5  ;;  %v536_v7 = vsub.f32 %v463_v33, %v528_v5  ;;  %v537_v8 = vsub.f32 %v491_v48, %v528_v5  ;;  %v521_v30 = vmul.f32 1.442695, %v518_v4 }
 0x1c2   :  { %v541_v9 = vmul.f32 1.442695, %v535_v6  ;;  %v543_v10 = vmul.f32 1.442695, %v536_v7  ;;  %v545_v11 = vmul.f32 1.442695, %v537_v8 }
 0x1c4   :  { %870 = vpow2.f32 %v541_v9 }
 0x1c5   :  { %872 = vpow2.f32 %v543_v10 }
 0x1c6   :  { %874 = vpow2.f32 %v545_v11 }
 0x1c7   :  { %v533_v12 = vpop.permute.xlu1 %532 }
 0x1c8   :  { %v538_v13 = vsub.f32 %v437_v39, %v533_v12  ;;  %v539_v14 = vsub.f32 %v465_v42, %v533_v12  ;;  %v540_v15 = vsub.f32 %v493_v55, %v533_v12 }
 0x1ca   :  { %v871_v16 = vpop.eup %870  ;;  %v547_v17 = vmul.f32 1.442695, %v538_v13  ;;  %v549_v18 = vmul.f32 1.442695, %v539_v14  ;;  %v551_v20 = vmul.f32 1.442695, %v540_v15 }
 0x1cb   :  { %v873_v19 = vpop.eup %872 }
 0x1cc   :  { %876 = vpow2.f32 %v547_v17  ;;  %v553_v21 = vadd.f32 %v873_v19, %v871_v16  ;;  %v875_v22 = vpop.eup %874 }
 0x1cd   :  { %878 = vpow2.f32 %v549_v18 }
 0x1ce   :  { %v554_v23 = vadd.f32 %v875_v22, %v553_v21  ;;  %880 = vpow2.f32 %v551_v20 }
 0x1cf   :  { %882 = vpow2.f32 %v519_v29 }
 0x1d0   :  { %555 = vadd.xlane.f32.xlu2 %v554_v23  ;;  %884 = vpow2.f32 %v521_v30 }
 0x1d2   :  { %v877_v24 = vpop.eup %876 }
 0x1d3   :  { %v879_v25 = vpop.eup %878 }
 0x1d4   :  { %v557_v26 = vadd.f32 %v879_v25, %v877_v24  ;;  %v881_v27 = vpop.eup %880 }
 0x1d5   :  { %v883_v31 = vpop.eup %882 }
 0x1d6   :  { %v558_v28 = vadd.f32 %v881_v27, %v557_v26  ;;  %v523_v33 = vmul.f32 %v883_v31, %v515_v32  ;;  %v885_v36 = vpop.eup %884 }
 0x1d7   :  { %v524_v38 = vmul.f32 %v885_v36, %v516_v37 }
 0x1d8   :  { %559 = vadd.xlane.f32.xlu2 %v558_v28 }
 0x243   :  { %v556_v34 = vpop.xlane.xlu2 %555 }
 0x244   :  { %v561_v35 = vadd.f32 %v556_v34, %v523_v33 }
 0x246   :  { %564 = vst.msk [vmem:[#allocation3] sm:$0xff] %vm66_vm0, %v561_v35 }
 0x24b   :  { %v560_v39 = vpop.xlane.xlu2 %559 }
 0x24c   :  { %v562_v40 = vadd.f32 %v560_v39, %v524_v38 }
 0x24d   :  { %v573_v41 = vld [vmem:[#allocation3] sm:$0xff] }
 0x24e   :  { %886 = vlog2.f32 %v573_v41  ;;  %565 = vst.msk [vmem:[#allocation3 + $0x8] sm:$0xff] %vm66_vm0, %v562_v40 }
 0x254   :  { %v887_v42 = vpop.eup %886 }
 0x255   :  { %v576_v43 = vmul.f32 0.6931472, %v887_v42  ;;  %v574_v44 = vld [vmem:[#allocation3 + $0x8] sm:$0xff] }
 0x256   :  { %888 = vlog2.f32 %v574_v44 }
 0x257   :  { %v579_v46 = vadd.f32 %v576_v43, %v571_v45 }
 0x259   :  { %581 = vst.msk [vmem:[%s1071_s4] sm:$0xff] %vm66_vm0, %v579_v46 }
 0x25c   :  { %v889_v47 = vpop.eup %888 }
 0x25d   :  { %v578_v48 = vmul.f32 0.6931472, %v889_v47 }
 0x25f   :  { %v580_v50 = vadd.f32 %v578_v48, %v572_v49 }
 0x261   :  { %582 = vst.msk [vmem:[%s1071_s4 + $0x8] sm:$0xff] %vm66_vm0, %v580_v50 }
 0x262   :  { %990 = dma.done.wait [#allocation6], 384  }
 0x263   :  { %991 = vsyncadd [#allocation6], 4294966912 }
 0x264   :  { %604 = vsyncpa [#allocation5], 1 }
 0x265   :  { %605 = vsyncpa [#allocation8], 1 }
 0x266   :  { %606 = vsyncpa [#allocation6], 1 }

</bundles_post_ra>
